<compile_context>
chip_gen: v6e
topology: v6e:2x2x1
jax: 0.10.0
libtpu: 0.0.40
codegen_flags: <defaults>
</compile_context>

<pallas_src>
import functools

import jax
import jax.numpy as jnp
from jax import lax
from jax.experimental import pallas as pl
from jax.experimental.pallas import tpu as pltpu


# ---------------------------------------------------------------------------
# Fused encoder + decoder kernel
# ---------------------------------------------------------------------------
def model_kernel(tok_tm_ref, w_comb_ref, w_proj_enc_ref, w_hh_ref, b_h_ref,
                 w_out_ref, probs_ref, enc_ref, xp_ref, hh_ref, *, B, S, C):
    f32 = jnp.float32
    bf16 = jnp.bfloat16
    V = w_comb_ref.shape[0]

    # ---- shared one-hot (time-major) + single combined embedding matmul ----
    tok = tok_tm_ref[...]                                          # [S*B, 1] int32
    lane_v = lax.broadcasted_iota(jnp.int32, (S * B, V), 1)
    one_hot = (tok == lane_v).astype(bf16)                         # [S*B, V] bf16
    comb = jnp.dot(one_hot, w_comb_ref[...],
                   preferred_element_type=f32)                     # [S*B, C+H] f32

    # ---- encoder: ReLU -> temporal average pool (avg=1) -> tanh projection --
    emb = jnp.maximum(comb[:, :C], 0.0)                            # [S*B, C]
    pooled = jnp.sum(emb.reshape(S, B, C), axis=0) * (1.0 / S)     # [B, C]
    enc = jnp.tanh(jnp.dot(pooled.astype(bf16), w_proj_enc_ref[...],
                           preferred_element_type=f32))            # [B, T] f32
    enc_ref[...] = enc

    # ---- decoder input projection (W_emb_dec @ W_xh folded) + bias ----------
    xp_ref[...] = comb[:, C:] + b_h_ref[...]                       # [S*B, H] f32

    # ---- serial recurrence: h_t = tanh(x_t + h_{t-1} @ W_hh) ----------------
    w_hh = w_hh_ref[...]                                           # bf16 (hoisted)
    h0 = enc                 # TODO(synk): verify vs. real LanguageModel init-state

    def step(t, h):
        off = pl.multiple_of(t * B, B)
        x_t = xp_ref[pl.ds(off, B), :]                             # [B, H] clean load
        h_new = jnp.tanh(x_t + jnp.dot(h.astype(bf16), w_hh,
                                       preferred_element_type=f32))
        hh_ref[pl.ds(off, B), :] = h_new                           # flat time-major
        return h_new

    lax.fori_loop(0, S, step, h0, unroll=True)

    # ---- ONE merged vocab projection + log-softmax over [S*B, V] ------------
    logits = jnp.dot(hh_ref[...].astype(bf16), w_out_ref[...],
                     preferred_element_type=f32)                   # [S*B, V] f32
    m = jnp.max(logits, axis=-1, keepdims=True)
    sh = logits - m
    logp = sh - jnp.log(jnp.sum(jnp.exp(sh), axis=-1, keepdims=True))
    logp3 = logp.reshape(S, B, logits.shape[-1])                   # time-major view
    for b in range(B):                                             # value-side split
        probs_ref[b] = logp3[:, b, :]                              # dense [S, V] store


# ---------------------------------------------------------------------------
# JointEmbeddingLoss — plain jnp (not part of forward(); tiny 4x4 gram).
# ---------------------------------------------------------------------------
def joint_embedding_loss(e1, e2):
    # Exact semantics of the PyTorch method (includes the diagonal terms and is
    # one-directional); diag taken from the gram matrix (== sum(e1*e2, -1)).
    n = e1.shape[0]
    gram = jnp.dot(e1, e2.T)
    diag = jnp.diagonal(gram)
    return jnp.sum(jnp.maximum(gram - diag[None, :] + 1.0, 0.0)) / (n * n)


# ---------------------------------------------------------------------------
# Parameter construction / one-time prep (outside the jitted forward)
# ---------------------------------------------------------------------------
def init_params(key, vocab_size, cnn_dim, txt_size, emb_size, rnn_size):
    ks = jax.random.split(key, 6)
    s = 0.02
    return {
        # encoder (DocumentCNN stand-in)
        "w_emb_enc": s * jax.random.normal(ks[0], (vocab_size, cnn_dim), jnp.float32),
        "w_proj_enc": s * jax.random.normal(ks[1], (cnn_dim, txt_size), jnp.float32),
        # decoder (LanguageModel stand-in)
        "w_emb_dec": s * jax.random.normal(ks[2], (vocab_size, emb_size), jnp.float32),
        "w_xh": s * jax.random.normal(ks[3], (emb_size, rnn_size), jnp.float32),
        "w_hh": s * jax.random.normal(ks[4], (rnn_size, rnn_size), jnp.float32),
        "b_h": jnp.zeros((1, rnn_size), jnp.float32),
        "w_out": s * jax.random.normal(ks[5], (rnn_size, vocab_size), jnp.float32),
    }


def prepare_params(params):
    """One-time weight prep: fold W_emb_dec @ W_xh (f32), concatenate with the
    encoder embedding table into one [V, C+H] RHS, and persist bf16 copies so
    the jitted forward does no per-call casts."""
    bf16 = jnp.bfloat16
    w_fold = jnp.dot(params["w_emb_dec"], params["w_xh"])          # f32 [V, H]
    w_comb = jnp.concatenate([params["w_emb_enc"], w_fold], axis=1).astype(bf16)
    return {
        "w_comb": w_comb,                                          # bf16 [V, C+H]
        "w_proj_enc": params["w_proj_enc"].astype(bf16),           # bf16 [C, T]
        "w_hh": params["w_hh"].astype(bf16),                       # bf16 [H, H]
        "b_h": params["b_h"],                                      # f32  [1, H]
        "w_out": params["w_out"].astype(bf16),                     # bf16 [H, V]
    }


# ---------------------------------------------------------------------------
# Model wrapper (forward pass)
# ---------------------------------------------------------------------------
@jax.jit
def model_forward(input_sentences, lengths, prep):
    # TODO(synk): lengths-based masking/packing not implemented (LanguageModel
    # source unavailable); log-probs are emitted for all S steps.
    del lengths
    B, S = input_sentences.shape
    V, CH = prep["w_comb"].shape
    H = prep["w_hh"].shape[0]
    C = CH - H
    T = prep["w_proj_enc"].shape[1]
    Vd = prep["w_out"].shape[1]
    assert T == H, "txtSize must equal rnn_size so the encoding seeds the RNN state"

    tok_tm = input_sentences.T.reshape(S * B, 1).astype(jnp.int32)  # time-major

    probs, encoded = pl.pallas_call(
        functools.partial(model_kernel, B=B, S=S, C=C),
        out_shape=(
            jax.ShapeDtypeStruct((B, S, Vd), jnp.float32),           # batch-major log-probs
            jax.ShapeDtypeStruct((B, T), jnp.float32),               # encoded
        ),
        grid=(1,),
        in_specs=[
            pl.BlockSpec((S * B, 1), lambda i: (0, 0)),
            pl.BlockSpec((V, CH), lambda i: (0, 0)),
            pl.BlockSpec((C, T), lambda i: (0, 0)),
            pl.BlockSpec((H, H), lambda i: (0, 0)),
            pl.BlockSpec((1, H), lambda i: (0, 0)),
            pl.BlockSpec((H, Vd), lambda i: (0, 0)),
        ],
        out_specs=(
            pl.BlockSpec((B, S, Vd), lambda i: (0, 0, 0)),
            pl.BlockSpec((B, T), lambda i: (0, 0)),
        ),
        scratch_shapes=[
            pltpu.VMEM((S * B, H), jnp.float32),   # folded input projection (+bias)
            pltpu.VMEM((S * B, H), jnp.float32),   # flat hidden-state history
        ],
        compiler_params=pltpu.CompilerParams(
            dimension_semantics=("arbitrary",)),
    )(tok_tm, prep["w_comb"], prep["w_proj_enc"], prep["w_hh"],
      prep["b_h"], prep["w_out"])
    return probs, encoded


if __name__ == "__main__":
    B, S = 4, 8          # batch, seq_length
    V = 128              # vocab_size
    CNN_DIM = 128        # cnn_dim
    TXT = 128            # txtSize (== rnn_size so the encoding seeds the RNN state)
    EMB = 128            # input_encoding_size
    RNN = 128            # rnn_size

    key = jax.random.PRNGKey(0)
    k_tok, k_par = jax.random.split(key)
    input_sentences = jax.random.randint(k_tok, (B, S), 0, V, dtype=jnp.int32)
    lengths = jnp.full((B,), S, dtype=jnp.int32)
    params = init_params(k_par, V, CNN_DIM, TXT, EMB, RNN)
    prep = prepare_params(params)            # one-time fold / concat / bf16 cast

    probs, encoded = model_forward(input_sentences, lengths, prep)
    loss = joint_embedding_loss(encoded, encoded)   # exercises the JEL path too
    jax.block_until_ready((probs, encoded, loss))

    assert probs.shape == (B, S, V) and probs.dtype == jnp.float32
    assert encoded.shape == (B, TXT) and encoded.dtype == jnp.float32
    assert loss.shape == () and bool(jnp.isfinite(loss))
    print("KERNEL_OK")
</pallas_src>

<mosaic_0001>
module attributes {stable_mosaic.version = 11 : i64} {
  func.func @model_kernel(%arg0: i32, %arg1: memref<32x1xi32, #tpu.memory_space<vmem>>, %arg2: memref<128x256xbf16, #tpu.memory_space<vmem>>, %arg3: memref<128x128xbf16, #tpu.memory_space<vmem>>, %arg4: memref<128x128xbf16, #tpu.memory_space<vmem>>, %arg5: memref<1x128xf32, #tpu.memory_space<vmem>>, %arg6: memref<128x128xbf16, #tpu.memory_space<vmem>>, %arg7: memref<4x8x128xf32, #tpu.memory_space<vmem>>, %arg8: memref<4x128xf32, #tpu.memory_space<vmem>>, %arg9: memref<32x128xf32, #tpu.memory_space<vmem>>, %arg10: memref<32x128xf32, #tpu.memory_space<vmem>>) attributes {dimension_semantics = [#tpu.dimension_semantics<arbitrary>], iteration_bounds = array<i64: 1>, scalar_prefetch = 0 : i64, scratch_operands = 2 : i64, tpu.core_type = #tpu.core_type<tc>, window_params = [{pipeline_mode = #tpu.pipeline_mode<synchronous>, transform_indices = @transform_0, window_bounds = array<i64: 32, 1>}, {pipeline_mode = #tpu.pipeline_mode<synchronous>, transform_indices = @transform_1, window_bounds = array<i64: 128, 256>}, {pipeline_mode = #tpu.pipeline_mode<synchronous>, transform_indices = @transform_2, window_bounds = array<i64: 128, 128>}, {pipeline_mode = #tpu.pipeline_mode<synchronous>, transform_indices = @transform_3, window_bounds = array<i64: 128, 128>}, {pipeline_mode = #tpu.pipeline_mode<synchronous>, transform_indices = @transform_4, window_bounds = array<i64: 1, 128>}, {pipeline_mode = #tpu.pipeline_mode<synchronous>, transform_indices = @transform_5, window_bounds = array<i64: 128, 128>}, {pipeline_mode = #tpu.pipeline_mode<synchronous>, transform_indices = @transform_6, window_bounds = array<i64: 4, 8, 128>}, {pipeline_mode = #tpu.pipeline_mode<synchronous>, transform_indices = @transform_7, window_bounds = array<i64: 4, 128>}]} {
    %c0 = arith.constant 0 : index
    %c0_0 = arith.constant 0 : index
    %0 = vector.load %arg1[%c0, %c0_0] : memref<32x1xi32, #tpu.memory_space<vmem>>, vector<32x1xi32>
    %1 = tpu.iota {dimensions = array<i32: 1>} : vector<32x128xi32>
    %2 = vector.broadcast %0 : vector<32x1xi32> to vector<32x128xi32>
    %3 = arith.cmpi eq, %2, %1 : vector<32x128xi32>
    %4 = arith.extui %3 : vector<32x128xi1> to vector<32x128xi32>
    %5 = arith.sitofp %4 : vector<32x128xi32> to vector<32x128xf32>
    %6 = arith.truncf %5 : vector<32x128xf32> to vector<32x128xbf16>
    %c0_1 = arith.constant 0 : index
    %c0_2 = arith.constant 0 : index
    %7 = vector.load %arg2[%c0_1, %c0_2] : memref<128x256xbf16, #tpu.memory_space<vmem>>, vector<128x256xbf16>
    %cst = arith.constant dense<0.000000e+00> : vector<32x256xf32>
    %8 = tpu.matmul %6, %7, %cst {dimension_numbers = #tpu.dot_dimension_numbers<[1], [0], [0], [1], [0, 0, 1, 1], [], []>} : vector<32x128xbf16>, vector<128x256xbf16>, vector<32x256xf32> -> vector<32x256xf32>
    %9 = vector.extract_strided_slice %8 {offsets = [0, 0], sizes = [32, 128], strides = [1, 1]} : vector<32x256xf32> to vector<32x128xf32>
    %cst_3 = arith.constant 0.000000e+00 : f32
    %10 = vector.broadcast %cst_3 : f32 to vector<32x128xf32>
    %11 = arith.maximumf %9, %10 : vector<32x128xf32>
    %12 = vector.shape_cast %11 : vector<32x128xf32> to vector<8x4x128xf32>
    %cst_4 = arith.constant dense<0.000000e+00> : vector<4x128xf32>
    %13 = vector.multi_reduction <add>, %12, %cst_4 [0] : vector<8x4x128xf32> to vector<4x128xf32>
    %cst_5 = arith.constant 1.250000e-01 : f32
    %14 = vector.broadcast %cst_5 : f32 to vector<4x128xf32>
    %15 = arith.mulf %13, %14 : vector<4x128xf32>
    %16 = arith.truncf %15 : vector<4x128xf32> to vector<4x128xbf16>
    %c0_6 = arith.constant 0 : index
    %c0_7 = arith.constant 0 : index
    %17 = vector.load %arg3[%c0_6, %c0_7] : memref<128x128xbf16, #tpu.memory_space<vmem>>, vector<128x128xbf16>
    %cst_8 = arith.constant dense<0.000000e+00> : vector<4x128xf32>
    %18 = tpu.matmul %16, %17, %cst_8 {dimension_numbers = #tpu.dot_dimension_numbers<[1], [0], [0], [1], [0, 0, 1, 1], [], []>} : vector<4x128xbf16>, vector<128x128xbf16>, vector<4x128xf32> -> vector<4x128xf32>
    %19 = math.tanh %18 : vector<4x128xf32>
    %c0_9 = arith.constant 0 : index
    %c0_10 = arith.constant 0 : index
    %20 = vector.load %arg8[%c0_9, %c0_10] : memref<4x128xf32, #tpu.memory_space<vmem>>, vector<4x128xf32>
    tpu.vector_store %arg8[%c0_9, %c0_10], %19 {strides = array<i32>} : memref<4x128xf32, #tpu.memory_space<vmem>>, vector<4x128xf32>,
    %21 = vector.extract_strided_slice %8 {offsets = [0, 128], sizes = [32, 128], strides = [1, 1]} : vector<32x256xf32> to vector<32x128xf32>
    %c0_11 = arith.constant 0 : index
    %c0_12 = arith.constant 0 : index
    %22 = vector.load %arg5[%c0_11, %c0_12] : memref<1x128xf32, #tpu.memory_space<vmem>>, vector<1x128xf32>
    %23 = vector.broadcast %22 : vector<1x128xf32> to vector<32x128xf32>
    %24 = arith.addf %21, %23 : vector<32x128xf32>
    %c0_13 = arith.constant 0 : index
    %c0_14 = arith.constant 0 : index
    %25 = vector.load %arg9[%c0_13, %c0_14] : memref<32x128xf32, #tpu.memory_space<vmem>>, vector<32x128xf32>
    tpu.vector_store %arg9[%c0_13, %c0_14], %24 {strides = array<i32>} : memref<32x128xf32, #tpu.memory_space<vmem>>, vector<32x128xf32>,
    %c0_15 = arith.constant 0 : index
    %c0_16 = arith.constant 0 : index
    %26 = vector.load %arg4[%c0_15, %c0_16] : memref<128x128xbf16, #tpu.memory_space<vmem>>, vector<128x128xbf16>
    %c0_i32 = arith.constant 0 : i32
    %c4_i32 = arith.constant 4 : i32
    %27 = arith.muli %c0_i32, %c4_i32 : i32
    %28 = tpu.assume_multiple %27, 4 : i32
    %29 = arith.index_cast %28 : i32 to index
    %c0_17 = arith.constant 0 : index
    %30 = vector.load %arg9[%29, %c0_17] : memref<32x128xf32, #tpu.memory_space<vmem>>, vector<4x128xf32>
    %31 = arith.truncf %19 : vector<4x128xf32> to vector<4x128xbf16>
    %cst_18 = arith.constant dense<0.000000e+00> : vector<4x128xf32>
    %32 = tpu.matmul %31, %26, %cst_18 {dimension_numbers = #tpu.dot_dimension_numbers<[1], [0], [0], [1], [0, 0, 1, 1], [], []>} : vector<4x128xbf16>, vector<128x128xbf16>, vector<4x128xf32> -> vector<4x128xf32>
    %33 = arith.addf %30, %32 : vector<4x128xf32>
    %34 = math.tanh %33 : vector<4x128xf32>
    %35 = arith.index_cast %28 : i32 to index
    %c0_19 = arith.constant 0 : index
    %36 = vector.load %arg10[%35, %c0_19] : memref<32x128xf32, #tpu.memory_space<vmem>>, vector<4x128xf32>
    tpu.vector_store %arg10[%35, %c0_19], %34 {strides = array<i32>} : memref<32x128xf32, #tpu.memory_space<vmem>>, vector<4x128xf32>,
    %c1_i32 = arith.constant 1 : i32
    %c4_i32_20 = arith.constant 4 : i32
    %37 = arith.muli %c1_i32, %c4_i32_20 : i32
    %38 = tpu.assume_multiple %37, 4 : i32
    %39 = arith.index_cast %38 : i32 to index
    %c0_21 = arith.constant 0 : index
    %40 = vector.load %arg9[%39, %c0_21] : memref<32x128xf32, #tpu.memory_space<vmem>>, vector<4x128xf32>
    %41 = arith.truncf %34 : vector<4x128xf32> to vector<4x128xbf16>
    %cst_22 = arith.constant dense<0.000000e+00> : vector<4x128xf32>
    %42 = tpu.matmul %41, %26, %cst_22 {dimension_numbers = #tpu.dot_dimension_numbers<[1], [0], [0], [1], [0, 0, 1, 1], [], []>} : vector<4x128xbf16>, vector<128x128xbf16>, vector<4x128xf32> -> vector<4x128xf32>
    %43 = arith.addf %40, %42 : vector<4x128xf32>
    %44 = math.tanh %43 : vector<4x128xf32>
    %45 = arith.index_cast %38 : i32 to index
    %c0_23 = arith.constant 0 : index
    %46 = vector.load %arg10[%45, %c0_23] : memref<32x128xf32, #tpu.memory_space<vmem>>, vector<4x128xf32>
    tpu.vector_store %arg10[%45, %c0_23], %44 {strides = array<i32>} : memref<32x128xf32, #tpu.memory_space<vmem>>, vector<4x128xf32>,
    %c2_i32 = arith.constant 2 : i32
    %c4_i32_24 = arith.constant 4 : i32
    %47 = arith.muli %c2_i32, %c4_i32_24 : i32
    %48 = tpu.assume_multiple %47, 4 : i32
    %49 = arith.index_cast %48 : i32 to index
    %c0_25 = arith.constant 0 : index
    %50 = vector.load %arg9[%49, %c0_25] : memref<32x128xf32, #tpu.memory_space<vmem>>, vector<4x128xf32>
    %51 = arith.truncf %44 : vector<4x128xf32> to vector<4x128xbf16>
    %cst_26 = arith.constant dense<0.000000e+00> : vector<4x128xf32>
    %52 = tpu.matmul %51, %26, %cst_26 {dimension_numbers = #tpu.dot_dimension_numbers<[1], [0], [0], [1], [0, 0, 1, 1], [], []>} : vector<4x128xbf16>, vector<128x128xbf16>, vector<4x128xf32> -> vector<4x128xf32>
    %53 = arith.addf %50, %52 : vector<4x128xf32>
    %54 = math.tanh %53 : vector<4x128xf32>
    %55 = arith.index_cast %48 : i32 to index
    %c0_27 = arith.constant 0 : index
    %56 = vector.load %arg10[%55, %c0_27] : memref<32x128xf32, #tpu.memory_space<vmem>>, vector<4x128xf32>
    tpu.vector_store %arg10[%55, %c0_27], %54 {strides = array<i32>} : memref<32x128xf32, #tpu.memory_space<vmem>>, vector<4x128xf32>,
    %c3_i32 = arith.constant 3 : i32
    %c4_i32_28 = arith.constant 4 : i32
    %57 = arith.muli %c3_i32, %c4_i32_28 : i32
    %58 = tpu.assume_multiple %57, 4 : i32
    %59 = arith.index_cast %58 : i32 to index
    %c0_29 = arith.constant 0 : index
    %60 = vector.load %arg9[%59, %c0_29] : memref<32x128xf32, #tpu.memory_space<vmem>>, vector<4x128xf32>
    %61 = arith.truncf %54 : vector<4x128xf32> to vector<4x128xbf16>
    %cst_30 = arith.constant dense<0.000000e+00> : vector<4x128xf32>
    %62 = tpu.matmul %61, %26, %cst_30 {dimension_numbers = #tpu.dot_dimension_numbers<[1], [0], [0], [1], [0, 0, 1, 1], [], []>} : vector<4x128xbf16>, vector<128x128xbf16>, vector<4x128xf32> -> vector<4x128xf32>
    %63 = arith.addf %60, %62 : vector<4x128xf32>
    %64 = math.tanh %63 : vector<4x128xf32>
    %65 = arith.index_cast %58 : i32 to index
    %c0_31 = arith.constant 0 : index
    %66 = vector.load %arg10[%65, %c0_31] : memref<32x128xf32, #tpu.memory_space<vmem>>, vector<4x128xf32>
    tpu.vector_store %arg10[%65, %c0_31], %64 {strides = array<i32>} : memref<32x128xf32, #tpu.memory_space<vmem>>, vector<4x128xf32>,
    %c4_i32_32 = arith.constant 4 : i32
    %c4_i32_33 = arith.constant 4 : i32
    %67 = arith.muli %c4_i32_32, %c4_i32_33 : i32
    %68 = tpu.assume_multiple %67, 4 : i32
    %69 = arith.index_cast %68 : i32 to index
    %c0_34 = arith.constant 0 : index
    %70 = vector.load %arg9[%69, %c0_34] : memref<32x128xf32, #tpu.memory_space<vmem>>, vector<4x128xf32>
    %71 = arith.truncf %64 : vector<4x128xf32> to vector<4x128xbf16>
    %cst_35 = arith.constant dense<0.000000e+00> : vector<4x128xf32>
    %72 = tpu.matmul %71, %26, %cst_35 {dimension_numbers = #tpu.dot_dimension_numbers<[1], [0], [0], [1], [0, 0, 1, 1], [], []>} : vector<4x128xbf16>, vector<128x128xbf16>, vector<4x128xf32> -> vector<4x128xf32>
    %73 = arith.addf %70, %72 : vector<4x128xf32>
    %74 = math.tanh %73 : vector<4x128xf32>
    %75 = arith.index_cast %68 : i32 to index
    %c0_36 = arith.constant 0 : index
    %76 = vector.load %arg10[%75, %c0_36] : memref<32x128xf32, #tpu.memory_space<vmem>>, vector<4x128xf32>
    tpu.vector_store %arg10[%75, %c0_36], %74 {strides = array<i32>} : memref<32x128xf32, #tpu.memory_space<vmem>>, vector<4x128xf32>,
    %c5_i32 = arith.constant 5 : i32
    %c4_i32_37 = arith.constant 4 : i32
    %77 = arith.muli %c5_i32, %c4_i32_37 : i32
    %78 = tpu.assume_multiple %77, 4 : i32
    %79 = arith.index_cast %78 : i32 to index
    %c0_38 = arith.constant 0 : index
    %80 = vector.load %arg9[%79, %c0_38] : memref<32x128xf32, #tpu.memory_space<vmem>>, vector<4x128xf32>
    %81 = arith.truncf %74 : vector<4x128xf32> to vector<4x128xbf16>
    %cst_39 = arith.constant dense<0.000000e+00> : vector<4x128xf32>
    %82 = tpu.matmul %81, %26, %cst_39 {dimension_numbers = #tpu.dot_dimension_numbers<[1], [0], [0], [1], [0, 0, 1, 1], [], []>} : vector<4x128xbf16>, vector<128x128xbf16>, vector<4x128xf32> -> vector<4x128xf32>
    %83 = arith.addf %80, %82 : vector<4x128xf32>
    %84 = math.tanh %83 : vector<4x128xf32>
    %85 = arith.index_cast %78 : i32 to index
    %c0_40 = arith.constant 0 : index
    %86 = vector.load %arg10[%85, %c0_40] : memref<32x128xf32, #tpu.memory_space<vmem>>, vector<4x128xf32>
    tpu.vector_store %arg10[%85, %c0_40], %84 {strides = array<i32>} : memref<32x128xf32, #tpu.memory_space<vmem>>, vector<4x128xf32>,
    %c6_i32 = arith.constant 6 : i32
    %c4_i32_41 = arith.constant 4 : i32
    %87 = arith.muli %c6_i32, %c4_i32_41 : i32
    %88 = tpu.assume_multiple %87, 4 : i32
    %89 = arith.index_cast %88 : i32 to index
    %c0_42 = arith.constant 0 : index
    %90 = vector.load %arg9[%89, %c0_42] : memref<32x128xf32, #tpu.memory_space<vmem>>, vector<4x128xf32>
    %91 = arith.truncf %84 : vector<4x128xf32> to vector<4x128xbf16>
    %cst_43 = arith.constant dense<0.000000e+00> : vector<4x128xf32>
    %92 = tpu.matmul %91, %26, %cst_43 {dimension_numbers = #tpu.dot_dimension_numbers<[1], [0], [0], [1], [0, 0, 1, 1], [], []>} : vector<4x128xbf16>, vector<128x128xbf16>, vector<4x128xf32> -> vector<4x128xf32>
    %93 = arith.addf %90, %92 : vector<4x128xf32>
    %94 = math.tanh %93 : vector<4x128xf32>
    %95 = arith.index_cast %88 : i32 to index
    %c0_44 = arith.constant 0 : index
    %96 = vector.load %arg10[%95, %c0_44] : memref<32x128xf32, #tpu.memory_space<vmem>>, vector<4x128xf32>
    tpu.vector_store %arg10[%95, %c0_44], %94 {strides = array<i32>} : memref<32x128xf32, #tpu.memory_space<vmem>>, vector<4x128xf32>,
    %c7_i32 = arith.constant 7 : i32
    %c4_i32_45 = arith.constant 4 : i32
    %97 = arith.muli %c7_i32, %c4_i32_45 : i32
    %98 = tpu.assume_multiple %97, 4 : i32
    %99 = arith.index_cast %98 : i32 to index
    %c0_46 = arith.constant 0 : index
    %100 = vector.load %arg9[%99, %c0_46] : memref<32x128xf32, #tpu.memory_space<vmem>>, vector<4x128xf32>
    %101 = arith.truncf %94 : vector<4x128xf32> to vector<4x128xbf16>
    %cst_47 = arith.constant dense<0.000000e+00> : vector<4x128xf32>
    %102 = tpu.matmul %101, %26, %cst_47 {dimension_numbers = #tpu.dot_dimension_numbers<[1], [0], [0], [1], [0, 0, 1, 1], [], []>} : vector<4x128xbf16>, vector<128x128xbf16>, vector<4x128xf32> -> vector<4x128xf32>
    %103 = arith.addf %100, %102 : vector<4x128xf32>
    %104 = math.tanh %103 : vector<4x128xf32>
    %105 = arith.index_cast %98 : i32 to index
    %c0_48 = arith.constant 0 : index
    %106 = vector.load %arg10[%105, %c0_48] : memref<32x128xf32, #tpu.memory_space<vmem>>, vector<4x128xf32>
    tpu.vector_store %arg10[%105, %c0_48], %104 {strides = array<i32>} : memref<32x128xf32, #tpu.memory_space<vmem>>, vector<4x128xf32>,
    %c8_i32 = arith.constant 8 : i32
    %c0_49 = arith.constant 0 : index
    %c0_50 = arith.constant 0 : index
    %107 = vector.load %arg10[%c0_49, %c0_50] : memref<32x128xf32, #tpu.memory_space<vmem>>, vector<32x128xf32>
    %108 = arith.truncf %107 : vector<32x128xf32> to vector<32x128xbf16>
    %c0_51 = arith.constant 0 : index
    %c0_52 = arith.constant 0 : index
    %109 = vector.load %arg6[%c0_51, %c0_52] : memref<128x128xbf16, #tpu.memory_space<vmem>>, vector<128x128xbf16>
    %cst_53 = arith.constant dense<0.000000e+00> : vector<32x128xf32>
    %110 = tpu.matmul %108, %109, %cst_53 {dimension_numbers = #tpu.dot_dimension_numbers<[1], [0], [0], [1], [0, 0, 1, 1], [], []>} : vector<32x128xbf16>, vector<128x128xbf16>, vector<32x128xf32> -> vector<32x128xf32>
    %cst_54 = arith.constant dense<0xFF800000> : vector<32xf32>
    %111 = vector.multi_reduction <maximumf>, %110, %cst_54 [1] : vector<32x128xf32> to vector<32xf32>
    %112 = vector.shape_cast %111 : vector<32xf32> to vector<32x1xf32>
    %113 = vector.broadcast %112 : vector<32x1xf32> to vector<32x128xf32>
    %114 = arith.subf %110, %113 : vector<32x128xf32>
    %115 = math.exp %114 : vector<32x128xf32>
    %cst_55 = arith.constant dense<0.000000e+00> : vector<32xf32>
    %116 = vector.multi_reduction <add>, %115, %cst_55 [1] : vector<32x128xf32> to vector<32xf32>
    %117 = vector.shape_cast %116 : vector<32xf32> to vector<32x1xf32>
    %118 = math.log %117 : vector<32x1xf32>
    %119 = vector.broadcast %118 : vector<32x1xf32> to vector<32x128xf32>
    %120 = arith.subf %114, %119 : vector<32x128xf32>
    %121 = vector.shape_cast %120 : vector<32x128xf32> to vector<8x4x128xf32>
    %122 = vector.extract_strided_slice %121 {offsets = [0, 0, 0], sizes = [8, 1, 128], strides = [1, 1, 1]} : vector<8x4x128xf32> to vector<8x1x128xf32>
    %123 = vector.shape_cast %122 : vector<8x1x128xf32> to vector<8x128xf32>
    %c0_56 = arith.constant 0 : index
    %c0_57 = arith.constant 0 : index
    %c0_58 = arith.constant 0 : index
    %124 = vector.load %arg7[%c0_56, %c0_57, %c0_58] : memref<4x8x128xf32, #tpu.memory_space<vmem>>, vector<1x8x128xf32>
    %125 = vector.shape_cast %124 : vector<1x8x128xf32> to vector<8x128xf32>
    %126 = vector.shape_cast %123 : vector<8x128xf32> to vector<1x8x128xf32>
    tpu.vector_store %arg7[%c0_56, %c0_57, %c0_58], %126 {strides = array<i32>} : memref<4x8x128xf32, #tpu.memory_space<vmem>>, vector<1x8x128xf32>,
    %127 = vector.extract_strided_slice %121 {offsets = [0, 1, 0], sizes = [8, 1, 128], strides = [1, 1, 1]} : vector<8x4x128xf32> to vector<8x1x128xf32>
    %128 = vector.shape_cast %127 : vector<8x1x128xf32> to vector<8x128xf32>
    %c1 = arith.constant 1 : index
    %c0_59 = arith.constant 0 : index
    %c0_60 = arith.constant 0 : index
    %129 = vector.load %arg7[%c1, %c0_59, %c0_60] : memref<4x8x128xf32, #tpu.memory_space<vmem>>, vector<1x8x128xf32>
    %130 = vector.shape_cast %129 : vector<1x8x128xf32> to vector<8x128xf32>
    %131 = vector.shape_cast %128 : vector<8x128xf32> to vector<1x8x128xf32>
    tpu.vector_store %arg7[%c1, %c0_59, %c0_60], %131 {strides = array<i32>} : memref<4x8x128xf32, #tpu.memory_space<vmem>>, vector<1x8x128xf32>,
    %132 = vector.extract_strided_slice %121 {offsets = [0, 2, 0], sizes = [8, 1, 128], strides = [1, 1, 1]} : vector<8x4x128xf32> to vector<8x1x128xf32>
    %133 = vector.shape_cast %132 : vector<8x1x128xf32> to vector<8x128xf32>
    %c2 = arith.constant 2 : index
    %c0_61 = arith.constant 0 : index
    %c0_62 = arith.constant 0 : index
    %134 = vector.load %arg7[%c2, %c0_61, %c0_62] : memref<4x8x128xf32, #tpu.memory_space<vmem>>, vector<1x8x128xf32>
    %135 = vector.shape_cast %134 : vector<1x8x128xf32> to vector<8x128xf32>
    %136 = vector.shape_cast %133 : vector<8x128xf32> to vector<1x8x128xf32>
    tpu.vector_store %arg7[%c2, %c0_61, %c0_62], %136 {strides = array<i32>} : memref<4x8x128xf32, #tpu.memory_space<vmem>>, vector<1x8x128xf32>,
    %137 = vector.extract_strided_slice %121 {offsets = [0, 3, 0], sizes = [8, 1, 128], strides = [1, 1, 1]} : vector<8x4x128xf32> to vector<8x1x128xf32>
    %138 = vector.shape_cast %137 : vector<8x1x128xf32> to vector<8x128xf32>
    %c3 = arith.constant 3 : index
    %c0_63 = arith.constant 0 : index
    %c0_64 = arith.constant 0 : index
    %139 = vector.load %arg7[%c3, %c0_63, %c0_64] : memref<4x8x128xf32, #tpu.memory_space<vmem>>, vector<1x8x128xf32>
    %140 = vector.shape_cast %139 : vector<1x8x128xf32> to vector<8x128xf32>
    %141 = vector.shape_cast %138 : vector<8x128xf32> to vector<1x8x128xf32>
    tpu.vector_store %arg7[%c3, %c0_63, %c0_64], %141 {strides = array<i32>} : memref<4x8x128xf32, #tpu.memory_space<vmem>>, vector<1x8x128xf32>,
    return
  }
  func.func @transform_0(%arg0: i32) -> (i32, i32) {
    %c0_i32 = arith.constant 0 : i32
    %c0_i32_0 = arith.constant 0 : i32
    %c0_i32_1 = arith.constant 0 : i32
    return %c0_i32, %c0_i32_0 : i32, i32
  }
  func.func @transform_1(%arg0: i32) -> (i32, i32) {
    %c0_i32 = arith.constant 0 : i32
    %c0_i32_0 = arith.constant 0 : i32
    %c0_i32_1 = arith.constant 0 : i32
    return %c0_i32, %c0_i32_0 : i32, i32
  }
  func.func @transform_2(%arg0: i32) -> (i32, i32) {
    %c0_i32 = arith.constant 0 : i32
    %c0_i32_0 = arith.constant 0 : i32
    %c0_i32_1 = arith.constant 0 : i32
    return %c0_i32, %c0_i32_0 : i32, i32
  }
  func.func @transform_3(%arg0: i32) -> (i32, i32) {
    %c0_i32 = arith.constant 0 : i32
    %c0_i32_0 = arith.constant 0 : i32
    %c0_i32_1 = arith.constant 0 : i32
    return %c0_i32, %c0_i32_0 : i32, i32
  }
  func.func @transform_4(%arg0: i32) -> (i32, i32) {
    %c0_i32 = arith.constant 0 : i32
    %c0_i32_0 = arith.constant 0 : i32
    %c0_i32_1 = arith.constant 0 : i32
    return %c0_i32, %c0_i32_0 : i32, i32
  }
  func.func @transform_5(%arg0: i32) -> (i32, i32) {
    %c0_i32 = arith.constant 0 : i32
    %c0_i32_0 = arith.constant 0 : i32
    %c0_i32_1 = arith.constant 0 : i32
    return %c0_i32, %c0_i32_0 : i32, i32
  }
  func.func @transform_6(%arg0: i32) -> (i32, i32, i32) {
    %c0_i32 = arith.constant 0 : i32
    %c0_i32_0 = arith.constant 0 : i32
    %c0_i32_1 = arith.constant 0 : i32
    %c0_i32_2 = arith.constant 0 : i32
    return %c0_i32, %c0_i32_0, %c0_i32_1 : i32, i32, i32
  }
  func.func @transform_7(%arg0: i32) -> (i32, i32) {
    %c0_i32 = arith.constant 0 : i32
    %c0_i32_0 = arith.constant 0 : i32
    %c0_i32_1 = arith.constant 0 : i32
    return %c0_i32, %c0_i32_0 : i32, i32
  }
}

</mosaic_0001>

<bundles_post_ra>
// kernel: model_forward.1
= control target key start
LH: loop header
LB: loop body
LE: loop exit
PB: predicated region body
PF: predicated region fallthrough
CT: control target
= control target key end

     0   :  { %13 = vsyncpa [#allocation5], 0  ;;  %s2161_s0 = inlined_call_operand.vmem [shape: s32[32,1], index: 0, kind: input, shape index: {}]   ;;  %s2162_s1 = inlined_call_operand.hbm [shape: bf16[128,256], index: 1, kind: input, shape index: {}]   ;;  %s2163_s2 = inlined_call_operand.hbm [shape: bf16[128,128], index: 2, kind: input, shape index: {}]   ;;  %s2164_s3 = inlined_call_operand.hbm [shape: bf16[128,128], index: 3, kind: input, shape index: {}]   ;;  %s2165_s4 = inlined_call_operand.vmem [shape: f32[1,128], index: 4, kind: input, shape index: {}]   ;;  %s2166_s5 = inlined_call_operand.hbm [shape: bf16[128,128], index: 5, kind: input, shape index: {}]   ;;  %s2167_s6 = inlined_call_operand.hbm [shape: f32[4,8,128], index: 6, kind: output, shape index: {0}]   ;;  %s2168_s7 = inlined_call_operand.hbm [shape: f32[4,128], index: 7, kind: output, shape index: {1}]  }
   0x1   :  { %14 = vsyncpa [#allocation8], 0 }
   0x2   :  { %15 = vsyncpa [#allocation11], 0 }
   0x3   :  { %16 = vsyncpa [#allocation6], 0 }
   0x4   :  { %17 = vsyncpa [#allocation14], 0  ;;  %s1802_s24 = smov [#allocation7]  }
   0x5   :  { %s37_s25 = sshll.u32 %s1802_s24, 4  ;;  %s38_s25 = int_to_ptr.vmem [resolvable:$true] %s37_s25 }
   0x6   :  { %s1680_s26 = scalar_lea.vmem %s38_s25, 1024  ;;  %p1685_p1 = scmp.lt.s32.totalorder %s38_s25, %s38_s25 }
   0x7   :  { %p1681_p0 = scmp.ne.s32.totalorder %s38_s25, %s1680_s26  ;;  %p1686_p2 = scmp.lt.s32.totalorder %s1680_s26, %s1680_s26 }
   0x9   :  { %p1687_p3 = por %p1686_p2, %p1685_p1 }
   0xb   :  { %p1688_p4 = pnand %p1687_p3, %p1681_p0 }
   0xd   :  { %1691 = shalt.err (!%p1688_p4)
}
   0xe   :  { %s1803_s27 = smov 64   ;;  %s1804_s28 = smov 4  }
   0xf   :  { %43 = dma.hbm_to_vmem [thread:$0]  %s2163_s2, 1024, %s38_s25, [#allocation8], %s1803_s27, %s1803_s27, %s1804_s28  }
  0x10   :  { %s1805_s8 = smov [#allocation4]  }
  0x11   :  { %s25_s9 = sshll.u32 %s1805_s8, 4  ;;  %s26_s9 = int_to_ptr.vmem [resolvable:$true] %s25_s9 }
  0x12   :  { %s1700_s10 = scalar_lea.vmem %s26_s9, 2048  ;;  %p1705_p6 = scmp.lt.s32.totalorder %s26_s9, %s26_s9 }
  0x13   :  { %p1701_p5 = scmp.ne.s32.totalorder %s26_s9, %s1700_s10  ;;  %p1706_p7 = scmp.lt.s32.totalorder %s1700_s10, %s1700_s10 }
  0x15   :  { %p1707_p8 = por %p1706_p7, %p1705_p6 }
  0x17   :  { %p1708_p9 = pnand %p1707_p8, %p1701_p5 }
  0x19   :  { %1711 = shalt.err (!%p1708_p9)
}
  0x1a   :  { %s1806_s11 = smov 128   ;;  %s1807_s12 = smov 8  }
  0x1b   :  { %31 = dma.hbm_to_vmem [thread:$0]  %s2162_s1, 2048, %s26_s9, [#allocation5], %s1806_s11, %s1806_s11, %s1807_s12  }
  0x1c   :  { %s1808_s2 = smov [#allocation9]   ;;  %s1809_s16 = smov [#allocation10]  }
  0x1d   :  { %s49_s15 = sshll.u32 %s1808_s2, 4  ;;  %s63_s17 = sshll.u32 %s1809_s16, 4  ;;  %s50_s15 = int_to_ptr.vmem [resolvable:$true] %s49_s15  ;;  %s64_s17 = int_to_ptr.vmem [resolvable:$true] %s63_s17 }
  0x1e   :  { %s1720_s18 = scalar_lea.vmem %s50_s15, 1024  ;;  %p1725_p11 = scmp.lt.s32.totalorder %s50_s15, %s50_s15 }
  0x1f   :  { %p1721_p10 = scmp.ne.s32.totalorder %s50_s15, %s1720_s18  ;;  %p1726_p12 = scmp.lt.s32.totalorder %s1720_s18, %s1720_s18 }
  0x21   :  { %p1727_p13 = por %p1726_p12, %p1725_p11 }
  0x23   :  { %p1728_p0 = pnand %p1727_p13, %p1721_p10 }
  0x25   :  { %1731 = shalt.err (!%p1728_p0)
}
  0x26   :  { %55 = dma.hbm_to_vmem [thread:$0]  %s2164_s3, 1024, %s50_s15, [#allocation8], %s1803_s27, %s1803_s27, %s1804_s28  }
  0x27   :  { %s1740_s1 = scalar_lea.vmem %s64_s17, 1024  ;;  %p1745_p2 = scmp.lt.s32.totalorder %s64_s17, %s64_s17 }
  0x28   :  { %p1741_p1 = scmp.ne.s32.totalorder %s64_s17, %s1740_s1  ;;  %p1746_p3 = scmp.lt.s32.totalorder %s1740_s1, %s1740_s1 }
  0x2a   :  { %p1747_p4 = por %p1746_p3, %p1745_p2 }
  0x2c   :  { %p1748_p5 = pnand %p1747_p4, %p1741_p1 }
  0x2e   :  { %1751 = shalt.err (!%p1748_p5)
}
  0x2f   :  { %69 = dma.hbm_to_vmem [thread:$0]  %s2166_s5, 1024, %s64_s17, [#allocation11], %s1803_s27, %s1803_s27, %s1804_s28  }
  0x30   :  { %1792 = dma.done.wait [#allocation5], 2048  }
  0x31   :  { %1793 = vsyncadd [#allocation5], 4294965248 }
  0x32   :  { %1794 = dma.done.wait [#allocation8], 2048  }
  0x33   :  { %1795 = vsyncadd [#allocation8], 4294965248 }
  0x34   :  { %1796 = dma.done.wait [#allocation11], 1024  }
  0x35   :  { %1797 = vsyncadd [#allocation11], 4294966272  ;;  %v1810_v0 = vmov 0   ;;  %v83_v1 = vld [vmem:[%s2161_s0] sm:$0xff]  ;;  %v85_v2 = vld [vmem:[%s2161_s0 + $0x10] sm:$0xff]  ;;  %v1811_v13 = vmov 0.0   ;;  %v87_v24 = vlaneseq }
  0x36   :  { %1588 = vset.pattern.permute.xlu0 %v1810_v0  ;;  %1589 = vset.pattern.permute.xlu1 %v1810_v0  ;;  %v84_v3 = vld [vmem:[%s2161_s0 + $0x8] sm:$0xff]  ;;  %v86_v4 = vld [vmem:[%s2161_s0 + $0x18] sm:$0xff]  ;;  %v1615_v16 = vld [vmem:[#allocation7 + $0x30] sm:$0xff]   ;;  %v1812_v29 = vmov 1.0|1.0   ;;  %vm1813_vm6 = vmmov 0  }
  0x37   :  { %243 = vmatprep.mubr.bf16.mxu0 %v1810_v0  ;;  %90 = vperm.xlu0 %1588, %v83_v1   ;;  %v1590_v5 = vld [vmem:[#allocation4 + $0x74] ss:$8 sps:$4 sm:$0xff]   ;;  %v1592_v6 = vld [vmem:[#allocation4 + $0x70] ss:$8 sps:$4 sm:$0xff]   ;;  %v1593_v7 = vld [vmem:[#allocation4 + $0x64] ss:$8 sps:$4 sm:$0xff]  }
  0x38   :  { %96 = vperm.xlu1 %1589, %v85_v2   ;;  %211 = vmatprep.subr.bf16.mxu0 %v1590_v5  ;;  %v1595_v8 = vld [vmem:[#allocation4 + $0x60] ss:$8 sps:$4 sm:$0xff]   ;;  %v1596_v9 = vld [vmem:[#allocation4 + $0x54] ss:$8 sps:$4 sm:$0xff]   ;;  %v1598_v10 = vld [vmem:[#allocation4 + $0x50] ss:$8 sps:$4 sm:$0xff]  }
  0x39   :  { %212 = vmatpush1.bf16.msra.mxu0 %v1592_v6  ;;  %v1599_v11 = vld [vmem:[#allocation4 + $0x44] ss:$8 sps:$4 sm:$0xff]   ;;  %v1601_v12 = vld [vmem:[#allocation4 + $0x40] ss:$8 sps:$4 sm:$0xff]   ;;  %1374 = vmatprep.subr.bf16.mxu1 %v1811_v13  ;;  %v1614_v14 = vld [vmem:[#allocation7 + $0x38] sm:$0xff]   ;;  %v88_v26 = vand.u32 127, %v87_v24 }
  0x3a   :  { %213 = vmatprep.subr.bf16.mxu0 %v1593_v7  ;;  %v1602_v15 = vld [vmem:[#allocation4 + $0x34] ss:$8 sps:$4 sm:$0xff]   ;;  %1375 = vmatpush3.bf16.msra.mxu1 %v1614_v14  ;;  %v1604_v17 = vld [vmem:[#allocation4 + $0x30] ss:$8 sps:$4 sm:$0xff]   ;;  %v1605_v18 = vld [vmem:[#allocation4 + $0x24] ss:$8 sps:$4 sm:$0xff]  }
  0x3b   :  { %93 = vperm.xlu0 %1588, %v84_v3   ;;  %1376 = vmatprep.subr.bf16.mxu1 %v1811_v13  ;;  %v1607_v19 = vld [vmem:[#allocation4 + $0x20] ss:$8 sps:$4 sm:$0xff]   ;;  %v1608_v20 = vld [vmem:[#allocation4 + $0x14] ss:$8 sps:$4 sm:$0xff]   ;;  %v1610_v21 = vld [vmem:[#allocation4 + $0x10] ss:$8 sps:$4 sm:$0xff]  }
  0x3c   :  { %99 = vperm.xlu1 %1589, %v86_v4   ;;  %v1611_v22 = vld [vmem:[#allocation4 + $0x4] ss:$8 sps:$4 sm:$0xff]   ;;  %v1613_v23 = vld [vmem:[#allocation4] ss:$8 sps:$4 sm:$0xff]   ;;  %v1618_v33 = vld [vmem:[#allocation7 + $0x18] sm:$0xff]   ;;  %1390 = vmatprep.mubr.msk.bf16.mxu1 %vm1813_vm6, %v1811_v13  ;;  %vm280_vm7 = vcmask 1043456  }
  0x3d   :  { %214 = vmatpush1.bf16.msra.mxu0 %v1595_v8  ;;  %v1616_v31 = vld [vmem:[#allocation7 + $0x28] sm:$0xff]   ;;  %v1617_v32 = vld [vmem:[#allocation7 + $0x20] sm:$0xff]   ;;  %v1619_v34 = vld [vmem:[#allocation7 + $0x10] sm:$0xff]  }
  0x3e   :  { %215 = vmatprep.subr.bf16.mxu0 %v1596_v9  ;;  %1377 = vmatpush3.bf16.msra.mxu1 %v1615_v16  ;;  %v1620_v35 = vld [vmem:[#allocation7 + $0x8] sm:$0xff]   ;;  %v1621_v36 = vld [vmem:[#allocation7] sm:$0xff]   ;;  %v1911_v37 = vld [vmem:[#allocation9 + $0x38] sm:$0xff]  }
  0x3f   :  { %1378 = vmatprep.subr.bf16.mxu1 %v1811_v13  ;;  %v1914_v38 = vld [vmem:[#allocation9 + $0x30] sm:$0xff]   ;;  %v1918_v39 = vld [vmem:[#allocation9 + $0x28] sm:$0xff]   ;;  %v1922_v40 = vld [vmem:[#allocation9 + $0x20] sm:$0xff]  }
  0x40   :  { %v1266_v42 = vld [vmem:[%s2165_s4] ss:$0 sm:$0xff]  ;;  %v1948_v16 = vld [vmem:[#allocation9 + $0x18] sm:$0xff]   ;;  %s1814_s4 = smov [#allocation13]  }
  0x41   :  { %216 = vmatpush1.bf16.msra.mxu0 %v1598_v10  ;;  %s1219_s30 = sshll.u32 %s1814_s4, 4  ;;  %s1220_s30 = int_to_ptr.vmem [resolvable:$true] %s1219_s30 }
  0x42   :  { %217 = vmatprep.subr.bf16.mxu0 %v1599_v11  ;;  %1379 = vmatpush3.bf16.msra.mxu1 %v1616_v31  ;;  %s1752_s8 = scalar_lea.vmem %s1220_s30, 64  ;;  %p1757_p7 = scmp.lt.s32.totalorder %s1220_s30, %s1220_s30 }
  0x43   :  { %1380 = vmatprep.subr.bf16.mxu1 %v1811_v13  ;;  %p1753_p6 = scmp.ne.s32.totalorder %s1220_s30, %s1752_s8  ;;  %p1758_p8 = scmp.lt.s32.totalorder %s1752_s8, %s1752_s8 }
  0x45   :  { %218 = vmatpush1.bf16.msra.mxu0 %v1601_v12  ;;  %p1759_p9 = por %p1758_p8, %p1757_p7 }
  0x46   :  { %219 = vmatprep.subr.bf16.mxu0 %v1602_v15  ;;  %1381 = vmatpush3.bf16.msra.mxu1 %v1617_v32 }
  0x47   :  { %1382 = vmatprep.subr.bf16.mxu1 %v1811_v13  ;;  %p1760_p10 = pnand %p1759_p9, %p1753_p6 }
  0x49   :  { %220 = vmatpush1.bf16.msra.mxu0 %v1604_v17  ;;  %v1954_v17 = vld [vmem:[#allocation9 + $0x10] sm:$0xff]  }
  0x4a   :  { %221 = vmatprep.subr.bf16.mxu0 %v1605_v18  ;;  %1383 = vmatpush3.bf16.msra.mxu1 %v1618_v33  ;;  %v1960_v18 = vld [vmem:[#allocation9 + $0x8] sm:$0xff]  }
  0x4b   :  { %1384 = vmatprep.subr.bf16.mxu1 %v1811_v13 }
  0x4d   :  { %222 = vmatpush1.bf16.msra.mxu0 %v1607_v19  ;;  %v1966_v19 = vld [vmem:[#allocation9] sm:$0xff]  }
  0x4e   :  { %223 = vmatprep.subr.bf16.mxu0 %v1608_v20  ;;  %1385 = vmatpush3.bf16.msra.mxu1 %v1619_v34 }
  0x4f   :  { %1386 = vmatprep.subr.bf16.mxu1 %v1811_v13 }
  0x51   :  { %224 = vmatpush1.bf16.msra.mxu0 %v1610_v21 }
  0x52   :  { %225 = vmatprep.subr.bf16.mxu0 %v1611_v22  ;;  %1387 = vmatpush3.bf16.msra.mxu1 %v1620_v35 }
  0x53   :  { %1388 = vmatprep.subr.bf16.mxu1 %v1811_v13 }
  0x55   :  { %226 = vmatpush1.bf16.msra.mxu0 %v1613_v23 }
  0x56   :  { %1394 = vmatprep.subr.bf16.mxu0 %v1811_v13  ;;  %1389 = vmatpush3.bf16.msra.mxu1 %v1621_v36 }
  0x57   :  { %1414 = vmatprep.subr.bf16.mxu1 %v1811_v13 }
  0xb2   :  { %v91_v25 = vpop.permute.xlu0 %90 }
  0xb3   :  { %v97_v27 = vpop.permute.xlu1 %96  ;;  %vm101_vm0 = vcmp.eq.s32.totalorder %v91_v25, %v88_v26 }
  0xb4   :  { %vm103_vm3 = vcmp.eq.s32.totalorder %v97_v27, %v88_v26 }
  0xb6   :  { %v94_v28 = vpop.permute.xlu0 %93 }
  0xb7   :  { %vm102_vm1 = vcmp.eq.s32.totalorder %v94_v28, %v88_v26  ;;  %v100_v30 = vpop.permute.xlu1 %99 }
  0xb8   :  { %vm1254_vm2 = vmpackc.low %vm102_vm1, %vm101_vm0  ;;  %vm104_vm4 = vcmp.eq.s32.totalorder %v100_v30, %v88_v26 }
  0xb9   :  { %1255 = vmatmul.mubr.msk.bf16.vlgmr.msra.gmra.mxu0 %vm1254_vm2, %v1812_v29  ;;  %vm1256_vm5 = vmpackc.low %vm104_vm4, %vm103_vm3 }
  0xba   :  { %253 = vmatprep.mubr.bf16.mxu0 %v1810_v0  ;;  %1395 = vmatpush3.bf16.msra.mxu0 %v1911_v37 }
  0xbb   :  { %1396 = vmatprep.subr.bf16.mxu0 %v1811_v13 }
  0xbe   :  { %1397 = vmatpush3.bf16.msra.mxu0 %v1914_v38 }
  0xbf   :  { %1398 = vmatprep.subr.bf16.mxu0 %v1811_v13 }
  0xc1   :  { %1257 = vmatmul.mubr.msk.bf16.gmra.mxu0 %vm1256_vm5, %v1812_v29 }
  0xc2   :  { %1410 = vmatprep.mubr.msk.bf16.mxu0 %vm1813_vm6, %v1811_v13  ;;  %1399 = vmatpush3.bf16.msra.mxu0 %v1918_v39 }
  0xc3   :  { %1400 = vmatprep.subr.bf16.mxu0 %v1811_v13 }
  0xc6   :  { %1401 = vmatpush3.bf16.msra.mxu0 %v1922_v40 }
  0xc7   :  { %1402 = vmatprep.subr.bf16.mxu0 %v1811_v13 }
  0xca   :  { %1403 = vmatpush3.bf16.msra.mxu0 %v1948_v16 }
  0xcb   :  { %1404 = vmatprep.subr.bf16.mxu0 %v1811_v13 }
  0xce   :  { %1405 = vmatpush3.bf16.msra.mxu0 %v1954_v17 }
  0xcf   :  { %1406 = vmatprep.subr.bf16.mxu0 %v1811_v13 }
  0xd2   :  { %1407 = vmatpush3.bf16.msra.mxu0 %v1960_v18 }
  0xd3   :  { %1408 = vmatprep.subr.bf16.mxu0 %v1811_v13 }
  0xd6   :  { %1409 = vmatpush3.bf16.msra.mxu0 %v1966_v19 }
  0xd7   :  { %1434 = vmatprep.subr.bf16.mxu0 %v1811_v13 }
 0x179   :  { %v245_v41 = vpop.f32.mrf.mxu0 }
 0x17a   :  { %v264_v43 = vmax.f32 %v245_v41, 0.0 }
 0x17b   :  { %v247_v44 = vpop.f32.mrf.mxu0 }
 0x17c   :  { %v272_v45 = vcombine.high %v264_v43, %v264_v43  ;;  %v411_v46 = vadd.f32 %v1266_v42, %v247_v44  ;;  %v281_v48 = vsel %vm280_vm7, %v264_v43, 0.0 }
 0x17d   :  { %v249_v47 = vpop.f32.mrf.mxu0 }
 0x17e   :  { %v282_v49 = vsel %vm280_vm7, %v272_v45, 0.0  ;;  %415 = vst [vmem:[#allocation2] sm:$0xff] %v411_v46  ;;  %v265_v50 = vmax.f32 %v249_v47, 0.0 }
 0x17f   :  { %v283_v51 = vadd.f32 %v282_v49, %v281_v48  ;;  %v251_v52 = vpop.f32.mrf.mxu0 }
 0x180   :  { %v273_v53 = vcombine.high %v265_v50, %v265_v50  ;;  %v284_v54 = vsel %vm280_vm7, %v265_v50, 0.0  ;;  %v412_v55 = vadd.f32 %v1266_v42, %v251_v52 }
 0x181   :  { %v285_v56 = vadd.f32 %v284_v54, %v283_v51  ;;  %v255_v57 = vpop.f32.mrf.mxu0 }
 0x182   :  { %v286_v58 = vsel %vm280_vm7, %v273_v53, 0.0  ;;  %416 = vst [vmem:[#allocation2 + $0x8] sm:$0xff] %v412_v55  ;;  %v266_v59 = vmax.f32 %v255_v57, 0.0 }
 0x183   :  { %v287_v60 = vadd.f32 %v286_v58, %v285_v56  ;;  %v257_v61 = vpop.f32.mrf.mxu0 }
 0x184   :  { %v274_v62 = vcombine.high %v266_v59, %v266_v59  ;;  %v288_v63 = vsel %vm280_vm7, %v266_v59, 0.0  ;;  %v413_v0 = vadd.f32 %v1266_v42, %v257_v61 }
 0x185   :  { %v289_v1 = vadd.f32 %v288_v63, %v287_v60  ;;  %v259_v2 = vpop.f32.mrf.mxu0  ;;  %v435_v27 = vld [vmem:[#allocation2] sm:$0xf]  ;;  %v529_v35 = vld [vmem:[#allocation2 + $0x4] sm:$0xf] }
 0x186   :  { %v290_v3 = vsel %vm280_vm7, %v274_v62, 0.0  ;;  %417 = vst [vmem:[#allocation2 + $0x10] sm:$0xff] %v413_v0  ;;  %v267_v4 = vmax.f32 %v259_v2, 0.0 }
 0x187   :  { %v291_v5 = vadd.f32 %v290_v3, %v289_v1  ;;  %v261_v6 = vpop.f32.mrf.mxu0 }
 0x188   :  { %v275_v7 = vcombine.high %v267_v4, %v267_v4  ;;  %v292_v8 = vsel %vm280_vm7, %v267_v4, 0.0  ;;  %v414_v9 = vadd.f32 %v1266_v42, %v261_v6 }
 0x189   :  { %v293_v10 = vadd.f32 %v292_v8, %v291_v5  ;;  %v576_v47 = vld [vmem:[#allocation2 + $0x8] sm:$0xf]  ;;  %v623_v55 = vld [vmem:[#allocation2 + $0xc] sm:$0xf] }
 0x18a   :  { %v294_v11 = vsel %vm280_vm7, %v275_v7, 0.0  ;;  %418 = vst [vmem:[#allocation2 + $0x18] sm:$0xff] %v414_v9 }
 0x18b   :  { %v295_v12 = vadd.f32 %v294_v11, %v293_v10 }
 0x18d   :  { %v296_v14 = vmul.f32 0.125, %v295_v12  ;;  %v670_v63 = vld [vmem:[#allocation2 + $0x10] sm:$0xf] }
 0x18f   :  { %v297_v15 = vpack.c.bf16 %v296_v14, %v296_v14 }
 0x191   :  { %1391 = vmatmul.mubr.bf16.vlgmr.msra.gmra.mxu1 %v297_v15  ;;  %v1630_v15 = vld [vmem:[#allocation10 + $0x38] sm:$0xff]  }
 0x192   :  { %1415 = vmatpush3.bf16.msra.mxu1 %v1911_v37  ;;  %1430 = vmatprep.mubr.msk.bf16.mxu1 %vm1813_vm6, %v1811_v13 }
 0x193   :  { %1416 = vmatprep.subr.bf16.mxu1 %v1811_v13 }
 0x196   :  { %1417 = vmatpush3.bf16.msra.mxu1 %v1914_v38 }
 0x197   :  { %1418 = vmatprep.subr.bf16.mxu1 %v1811_v13 }
 0x19a   :  { %1419 = vmatpush3.bf16.msra.mxu1 %v1918_v39 }
 0x19b   :  { %1420 = vmatprep.subr.bf16.mxu1 %v1811_v13 }
 0x19e   :  { %1421 = vmatpush3.bf16.msra.mxu1 %v1922_v40 }
 0x19f   :  { %1422 = vmatprep.subr.bf16.mxu1 %v1811_v13 }
 0x1a2   :  { %1423 = vmatpush3.bf16.msra.mxu1 %v1948_v16 }
 0x1a3   :  { %1424 = vmatprep.subr.bf16.mxu1 %v1811_v13 }
 0x1a6   :  { %1425 = vmatpush3.bf16.msra.mxu1 %v1954_v17 }
 0x1a7   :  { %1426 = vmatprep.subr.bf16.mxu1 %v1811_v13 }
 0x1aa   :  { %1427 = vmatpush3.bf16.msra.mxu1 %v1960_v18 }
 0x1ab   :  { %1428 = vmatprep.subr.bf16.mxu1 %v1811_v13 }
 0x1ae   :  { %1429 = vmatpush3.bf16.msra.mxu1 %v1966_v19 }
 0x1af   :  { %1454 = vmatprep.subr.bf16.mxu1 %v1811_v13 }
 0x251   :  { %v396_v20 = vpop.f32.mrf.mxu1 }
 0x252   :  { %1638 = vtanh.f32 %v396_v20 }
 0x253   :  { %v1392_v21 = vpop.f32.mrf.mxu1 }
 0x255   :  { %v399_v22 = vpop.f32.mrf.mxu1 }
 0x257   :  { %v1393_v23 = vpop.f32.mrf.mxu1 }
 0x25f   :  { %v1639_v25 = vpop.eup %1638 }
 0x260   :  { %403 = vst [vmem:[#allocation13] sm:$0xf] %v1639_v25  ;;  %v436_v26 = vpack.c.bf16 %v1639_v25, %v1639_v25  ;;  %v1632_v25 = vld [vmem:[#allocation10 + $0x28] sm:$0xff]  }
 0x262   :  { %1411 = vmatmul.mubr.bf16.vlgmr.msra.gmra.mxu0 %v436_v26  ;;  %v1633_v26 = vld [vmem:[#allocation10 + $0x20] sm:$0xff]  }
 0x263   :  { %1435 = vmatpush3.bf16.msra.mxu0 %v1911_v37  ;;  %1450 = vmatprep.mubr.msk.bf16.mxu0 %vm1813_vm6, %v1811_v13 }
 0x264   :  { %1436 = vmatprep.subr.bf16.mxu0 %v1811_v13 }
 0x267   :  { %1437 = vmatpush3.bf16.msra.mxu0 %v1914_v38 }
 0x268   :  { %1438 = vmatprep.subr.bf16.mxu0 %v1811_v13 }
 0x26b   :  { %1439 = vmatpush3.bf16.msra.mxu0 %v1918_v39 }
 0x26c   :  { %1440 = vmatprep.subr.bf16.mxu0 %v1811_v13 }
 0x26f   :  { %1441 = vmatpush3.bf16.msra.mxu0 %v1922_v40 }
 0x270   :  { %1442 = vmatprep.subr.bf16.mxu0 %v1811_v13 }
 0x273   :  { %1443 = vmatpush3.bf16.msra.mxu0 %v1948_v16 }
 0x274   :  { %1444 = vmatprep.subr.bf16.mxu0 %v1811_v13 }
 0x277   :  { %1445 = vmatpush3.bf16.msra.mxu0 %v1954_v17 }
 0x278   :  { %1446 = vmatprep.subr.bf16.mxu0 %v1811_v13 }
 0x27b   :  { %1447 = vmatpush3.bf16.msra.mxu0 %v1960_v18 }
 0x27c   :  { %1448 = vmatprep.subr.bf16.mxu0 %v1811_v13 }
 0x27f   :  { %1449 = vmatpush3.bf16.msra.mxu0 %v1966_v19 }
 0x280   :  { %1474 = vmatprep.subr.bf16.mxu0 %v1811_v13 }
 0x322   :  { %v519_v28 = vpop.f32.mrf.mxu0 }
 0x323   :  { %v525_v29 = vadd.f32 %v519_v28, %v435_v27  ;;  %v1634_v27 = vld [vmem:[#allocation10 + $0x18] sm:$0xff]   ;;  %v1635_v28 = vld [vmem:[#allocation10 + $0x10] sm:$0xff]  }
 0x324   :  { %v1412_v30 = vpop.f32.mrf.mxu0 }
 0x325   :  { %1640 = vtanh.f32 %v525_v29  ;;  %v1636_v29 = vld [vmem:[#allocation10 + $0x8] sm:$0xff]   ;;  %v1637_v30 = vld [vmem:[#allocation10] sm:$0xff]  }
 0x326   :  { %v522_v31 = vpop.f32.mrf.mxu0 }
 0x327   :  { %v811_v31 = vld [vmem:[#allocation2 + $0x1c] sm:$0xf] }
 0x328   :  { %v1413_v32 = vpop.f32.mrf.mxu0 }
 0x332   :  { %v1641_v33 = vpop.eup %1640 }
 0x333   :  { %527 = vst [vmem:[#allocation3] sm:$0xf] %v1641_v33  ;;  %v530_v34 = vpack.c.bf16 %v1641_v33, %v1641_v33 }
 0x335   :  { %1431 = vmatmul.mubr.bf16.vlgmr.msra.gmra.mxu1 %v530_v34 }
 0x336   :  { %1455 = vmatpush3.bf16.msra.mxu1 %v1911_v37  ;;  %1470 = vmatprep.mubr.msk.bf16.mxu1 %vm1813_vm6, %v1811_v13 }
 0x337   :  { %1456 = vmatprep.subr.bf16.mxu1 %v1811_v13 }
 0x33a   :  { %1457 = vmatpush3.bf16.msra.mxu1 %v1914_v38 }
 0x33b   :  { %1458 = vmatprep.subr.bf16.mxu1 %v1811_v13 }
 0x33e   :  { %1459 = vmatpush3.bf16.msra.mxu1 %v1918_v39 }
 0x33f   :  { %1460 = vmatprep.subr.bf16.mxu1 %v1811_v13 }
 0x342   :  { %1461 = vmatpush3.bf16.msra.mxu1 %v1922_v40 }
 0x343   :  { %1462 = vmatprep.subr.bf16.mxu1 %v1811_v13 }
 0x346   :  { %1463 = vmatpush3.bf16.msra.mxu1 %v1948_v16 }
 0x347   :  { %1464 = vmatprep.subr.bf16.mxu1 %v1811_v13 }
 0x34a   :  { %1465 = vmatpush3.bf16.msra.mxu1 %v1954_v17 }
 0x34b   :  { %1466 = vmatprep.subr.bf16.mxu1 %v1811_v13 }
 0x34e   :  { %1467 = vmatpush3.bf16.msra.mxu1 %v1960_v18 }
 0x34f   :  { %1468 = vmatprep.subr.bf16.mxu1 %v1811_v13 }
 0x352   :  { %1469 = vmatpush3.bf16.msra.mxu1 %v1966_v19 }
 0x353   :  { %1494 = vmatprep.subr.bf16.mxu1 %v1811_v13 }
 0x3f5   :  { %v565_v36 = vpop.f32.mrf.mxu1 }
 0x3f6   :  { %v571_v41 = vadd.f32 %v565_v36, %v529_v35 }
 0x3f7   :  { %v1432_v42 = vpop.f32.mrf.mxu1 }
 0x3f8   :  { %1642 = vtanh.f32 %v571_v41 }
 0x3f9   :  { %v568_v43 = vpop.f32.mrf.mxu1 }
 0x3fb   :  { %v1433_v44 = vpop.f32.mrf.mxu1 }
 0x405   :  { %v1643_v45 = vpop.eup %1642 }
 0x406   :  { %574 = vst [vmem:[#allocation3 + $0x4] sm:$0xf] %v1643_v45  ;;  %v577_v46 = vpack.c.bf16 %v1643_v45, %v1643_v45 }
 0x408   :  { %1451 = vmatmul.mubr.bf16.vlgmr.msra.gmra.mxu0 %v577_v46 }
 0x409   :  { %1475 = vmatpush3.bf16.msra.mxu0 %v1911_v37  ;;  %1490 = vmatprep.mubr.msk.bf16.mxu0 %vm1813_vm6, %v1811_v13 }
 0x40a   :  { %1476 = vmatprep.subr.bf16.mxu0 %v1811_v13 }
 0x40d   :  { %1477 = vmatpush3.bf16.msra.mxu0 %v1914_v38  ;;  %v857_v12 = vld [vmem:[#allocation3] sm:$0xff] }
 0x40e   :  { %1478 = vmatprep.subr.bf16.mxu0 %v1811_v13 }
 0x411   :  { %1479 = vmatpush3.bf16.msra.mxu0 %v1918_v39 }
 0x412   :  { %1480 = vmatprep.subr.bf16.mxu0 %v1811_v13 }
 0x415   :  { %1481 = vmatpush3.bf16.msra.mxu0 %v1922_v40 }
 0x416   :  { %1482 = vmatprep.subr.bf16.mxu0 %v1811_v13 }
 0x419   :  { %1483 = vmatpush3.bf16.msra.mxu0 %v1948_v16 }
 0x41a   :  { %1484 = vmatprep.subr.bf16.mxu0 %v1811_v13 }
 0x41d   :  { %1485 = vmatpush3.bf16.msra.mxu0 %v1954_v17 }
 0x41e   :  { %1486 = vmatprep.subr.bf16.mxu0 %v1811_v13 }
 0x421   :  { %1487 = vmatpush3.bf16.msra.mxu0 %v1960_v18 }
 0x422   :  { %1488 = vmatprep.subr.bf16.mxu0 %v1811_v13 }
 0x425   :  { %1489 = vmatpush3.bf16.msra.mxu0 %v1966_v19 }
 0x426   :  { %1514 = vmatprep.subr.bf16.mxu0 %v1811_v13 }
 0x4c8   :  { %v612_v48 = vpop.f32.mrf.mxu0 }
 0x4c9   :  { %v618_v49 = vadd.f32 %v612_v48, %v576_v47 }
 0x4ca   :  { %v1452_v50 = vpop.f32.mrf.mxu0 }
 0x4cb   :  { %1644 = vtanh.f32 %v618_v49 }
 0x4cc   :  { %v615_v51 = vpop.f32.mrf.mxu0 }
 0x4ce   :  { %v1453_v52 = vpop.f32.mrf.mxu0 }
 0x4d8   :  { %v1645_v53 = vpop.eup %1644 }
 0x4d9   :  { %621 = vst [vmem:[#allocation3 + $0x8] sm:$0xf] %v1645_v53  ;;  %v624_v54 = vpack.c.bf16 %v1645_v53, %v1645_v53 }
 0x4db   :  { %1471 = vmatmul.mubr.bf16.vlgmr.msra.gmra.mxu1 %v624_v54 }
 0x4dc   :  { %1495 = vmatpush3.bf16.msra.mxu1 %v1911_v37  ;;  %1510 = vmatprep.mubr.msk.bf16.mxu1 %vm1813_vm6, %v1811_v13 }
 0x4dd   :  { %1496 = vmatprep.subr.bf16.mxu1 %v1811_v13 }
 0x4e0   :  { %1497 = vmatpush3.bf16.msra.mxu1 %v1914_v38 }
 0x4e1   :  { %1498 = vmatprep.subr.bf16.mxu1 %v1811_v13 }
 0x4e4   :  { %1499 = vmatpush3.bf16.msra.mxu1 %v1918_v39 }
 0x4e5   :  { %1500 = vmatprep.subr.bf16.mxu1 %v1811_v13 }
 0x4e8   :  { %1501 = vmatpush3.bf16.msra.mxu1 %v1922_v40 }
 0x4e9   :  { %1502 = vmatprep.subr.bf16.mxu1 %v1811_v13 }
 0x4ec   :  { %1503 = vmatpush3.bf16.msra.mxu1 %v1948_v16 }
 0x4ed   :  { %1504 = vmatprep.subr.bf16.mxu1 %v1811_v13 }
 0x4f0   :  { %1505 = vmatpush3.bf16.msra.mxu1 %v1954_v17 }
 0x4f1   :  { %1506 = vmatprep.subr.bf16.mxu1 %v1811_v13 }
 0x4f4   :  { %1507 = vmatpush3.bf16.msra.mxu1 %v1960_v18 }
 0x4f5   :  { %1508 = vmatprep.subr.bf16.mxu1 %v1811_v13 }
 0x4f8   :  { %1509 = vmatpush3.bf16.msra.mxu1 %v1966_v19 }
 0x4f9   :  { %1534 = vmatprep.subr.bf16.mxu1 %v1811_v13 }
 0x59b   :  { %v659_v56 = vpop.f32.mrf.mxu1 }
 0x59c   :  { %v665_v57 = vadd.f32 %v659_v56, %v623_v55 }
 0x59d   :  { %v1472_v58 = vpop.f32.mrf.mxu1 }
 0x59e   :  { %1646 = vtanh.f32 %v665_v57 }
 0x59f   :  { %v662_v59 = vpop.f32.mrf.mxu1 }
 0x5a1   :  { %v1473_v60 = vpop.f32.mrf.mxu1 }
 0x5ab   :  { %v1647_v61 = vpop.eup %1646 }
 0x5ac   :  { %668 = vst [vmem:[#allocation3 + $0xc] sm:$0xf] %v1647_v61  ;;  %v671_v62 = vpack.c.bf16 %v1647_v61, %v1647_v61 }
 0x5ae   :  { %1491 = vmatmul.mubr.bf16.vlgmr.msra.gmra.mxu0 %v671_v62 }
 0x5af   :  { %1515 = vmatpush3.bf16.msra.mxu0 %v1911_v37  ;;  %1530 = vmatprep.mubr.msk.bf16.mxu0 %vm1813_vm6, %v1811_v13 }
 0x5b0   :  { %1516 = vmatprep.subr.bf16.mxu0 %v1811_v13 }
 0x5b3   :  { %1517 = vmatpush3.bf16.msra.mxu0 %v1914_v38  ;;  %v858_v9 = vld [vmem:[#allocation3 + $0x8] sm:$0xff] }
 0x5b4   :  { %1518 = vmatprep.subr.bf16.mxu0 %v1811_v13  ;;  %v861_v14 = vpack.c.bf16 %v858_v9, %v857_v12 }
 0x5b7   :  { %1519 = vmatpush3.bf16.msra.mxu0 %v1918_v39 }
 0x5b8   :  { %1520 = vmatprep.subr.bf16.mxu0 %v1811_v13 }
 0x5bb   :  { %1521 = vmatpush3.bf16.msra.mxu0 %v1922_v40 }
 0x5bc   :  { %1522 = vmatprep.subr.bf16.mxu0 %v1811_v13 }
 0x5bf   :  { %1523 = vmatpush3.bf16.msra.mxu0 %v1948_v16 }
 0x5c0   :  { %1524 = vmatprep.subr.bf16.mxu0 %v1811_v13 }
 0x5c3   :  { %1525 = vmatpush3.bf16.msra.mxu0 %v1954_v17 }
 0x5c4   :  { %1526 = vmatprep.subr.bf16.mxu0 %v1811_v13 }
 0x5c7   :  { %1527 = vmatpush3.bf16.msra.mxu0 %v1960_v18 }
 0x5c8   :  { %1528 = vmatprep.subr.bf16.mxu0 %v1811_v13 }
 0x5cb   :  { %1529 = vmatpush3.bf16.msra.mxu0 %v1966_v19 }
 0x5cc   :  { %1554 = vmatprep.subr.bf16.mxu0 %v1630_v15 }
 0x66e   :  { %v706_v0 = vpop.f32.mrf.mxu0 }
 0x66f   :  { %v712_v1 = vadd.f32 %v706_v0, %v670_v63 }
 0x670   :  { %v1492_v2 = vpop.f32.mrf.mxu0 }
 0x671   :  { %1648 = vtanh.f32 %v712_v1 }
 0x672   :  { %v709_v3 = vpop.f32.mrf.mxu0 }
 0x674   :  { %v1493_v4 = vpop.f32.mrf.mxu0 }
 0x67e   :  { %v1649_v5 = vpop.eup %1648 }
 0x67f   :  { %715 = vst [vmem:[#allocation3 + $0x10] sm:$0xf] %v1649_v5  ;;  %v718_v6 = vpack.c.bf16 %v1649_v5, %v1649_v5 }
 0x681   :  { %1511 = vmatmul.mubr.bf16.vlgmr.msra.gmra.mxu1 %v718_v6 }
 0x682   :  { %1535 = vmatpush3.bf16.msra.mxu1 %v1911_v37  ;;  %1550 = vmatprep.mubr.msk.bf16.mxu1 %vm1813_vm6, %v1811_v13  ;;  %v717_v37 = vld [vmem:[#allocation2 + $0x14] sm:$0xf] }
 0x683   :  { %1536 = vmatprep.subr.bf16.mxu1 %v1811_v13 }
 0x686   :  { %1537 = vmatpush3.bf16.msra.mxu1 %v1914_v38 }
 0x687   :  { %1538 = vmatprep.subr.bf16.mxu1 %v1811_v13 }
 0x68a   :  { %1539 = vmatpush3.bf16.msra.mxu1 %v1918_v39 }
 0x68b   :  { %1540 = vmatprep.subr.bf16.mxu1 %v1811_v13 }
 0x68e   :  { %1541 = vmatpush3.bf16.msra.mxu1 %v1922_v40 }
 0x68f   :  { %1542 = vmatprep.subr.bf16.mxu1 %v1811_v13 }
 0x692   :  { %1543 = vmatpush3.bf16.msra.mxu1 %v1948_v16  ;;  %v1631_v16 = vld [vmem:[#allocation10 + $0x30] sm:$0xff]  }
 0x693   :  { %1544 = vmatprep.subr.bf16.mxu1 %v1811_v13 }
 0x696   :  { %1545 = vmatpush3.bf16.msra.mxu1 %v1954_v17 }
 0x697   :  { %1546 = vmatprep.subr.bf16.mxu1 %v1811_v13 }
 0x69a   :  { %1547 = vmatpush3.bf16.msra.mxu1 %v1960_v18 }
 0x69b   :  { %1548 = vmatprep.subr.bf16.mxu1 %v1811_v13  ;;  %v764_v13 = vld [vmem:[#allocation2 + $0x18] sm:$0xf] }
 0x69e   :  { %1549 = vmatpush3.bf16.msra.mxu1 %v1966_v19 }
 0x741   :  { %v753_v38 = vpop.f32.mrf.mxu1 }
 0x742   :  { %v759_v39 = vadd.f32 %v753_v38, %v717_v37 }
 0x743   :  { %v1512_v40 = vpop.f32.mrf.mxu1 }
 0x744   :  { %1650 = vtanh.f32 %v759_v39 }
 0x745   :  { %v756_v7 = vpop.f32.mrf.mxu1 }
 0x747   :  { %v1513_v8 = vpop.f32.mrf.mxu1 }
 0x751   :  { %v1651_v10 = vpop.eup %1650 }
 0x752   :  { %762 = vst [vmem:[#allocation3 + $0x14] sm:$0xf] %v1651_v10  ;;  %v765_v11 = vpack.c.bf16 %v1651_v10, %v1651_v10 }
 0x754   :  { %1531 = vmatmul.mubr.bf16.vlgmr.msra.gmra.mxu0 %v765_v11 }
 0x755   :  { %1570 = vmatprep.mubr.bf16.mxu0 %v861_v14  ;;  %1555 = vmatpush3.bf16.msra.mxu0 %v1630_v15 }
 0x756   :  { %1556 = vmatprep.subr.bf16.mxu0 %v1631_v16 }
 0x759   :  { %1557 = vmatpush3.bf16.msra.mxu0 %v1631_v16  ;;  %v859_v42 = vld [vmem:[#allocation3 + $0x10] sm:$0xff] }
 0x75a   :  { %1558 = vmatprep.subr.bf16.mxu0 %v1632_v25 }
 0x75d   :  { %1559 = vmatpush3.bf16.msra.mxu0 %v1632_v25 }
 0x75e   :  { %1560 = vmatprep.subr.bf16.mxu0 %v1633_v26 }
 0x761   :  { %1561 = vmatpush3.bf16.msra.mxu0 %v1633_v26 }
 0x762   :  { %1562 = vmatprep.subr.bf16.mxu0 %v1634_v27 }
 0x765   :  { %1563 = vmatpush3.bf16.msra.mxu0 %v1634_v27 }
 0x766   :  { %1564 = vmatprep.subr.bf16.mxu0 %v1635_v28 }
 0x769   :  { %1565 = vmatpush3.bf16.msra.mxu0 %v1635_v28 }
 0x76a   :  { %1566 = vmatprep.subr.bf16.mxu0 %v1636_v29 }
 0x76d   :  { %1567 = vmatpush3.bf16.msra.mxu0 %v1636_v29 }
 0x76e   :  { %1568 = vmatprep.subr.bf16.mxu0 %v1637_v30 }
 0x771   :  { %1569 = vmatpush3.bf16.msra.mxu0 %v1637_v30 }
 0x814   :  { %v800_v17 = vpop.f32.mrf.mxu0 }
 0x815   :  { %v806_v18 = vadd.f32 %v800_v17, %v764_v13 }
 0x816   :  { %v1532_v19 = vpop.f32.mrf.mxu0 }
 0x817   :  { %1652 = vtanh.f32 %v806_v18 }
 0x818   :  { %v803_v20 = vpop.f32.mrf.mxu0 }
 0x81a   :  { %v1533_v21 = vpop.f32.mrf.mxu0 }
 0x824   :  { %v1653_v22 = vpop.eup %1652 }
 0x825   :  { %809 = vst [vmem:[#allocation3 + $0x18] sm:$0xf] %v1653_v22  ;;  %v812_v23 = vpack.c.bf16 %v1653_v22, %v1653_v22 }
 0x827   :  { %1551 = vmatmul.mubr.bf16.vlgmr.msra.gmra.mxu1 %v812_v23 }
 0x8e7   :  { %v847_v32 = vpop.f32.mrf.mxu1 }
 0x8e8   :  { %v853_v33 = vadd.f32 %v847_v32, %v811_v31 }
 0x8e9   :  { %v1552_v34 = vpop.f32.mrf.mxu1 }
 0x8ea   :  { %1654 = vtanh.f32 %v853_v33 }
 0x8eb   :  { %v850_v35 = vpop.f32.mrf.mxu1 }
 0x8ed   :  { %v1553_v36 = vpop.f32.mrf.mxu1 }
 0x8f7   :  { %v1655_v41 = vpop.eup %1654 }
 0x8f8   :  { %856 = vst [vmem:[#allocation3 + $0x1c] sm:$0xf] %v1655_v41 }
 0x8ff   :  { %v860_v43 = vld [vmem:[#allocation3 + $0x18] sm:$0xff] }
 0x900   :  { %v862_v44 = vpack.c.bf16 %v860_v43, %v859_v42 }
 0x902   :  { %1571 = vmatmul.mubr.bf16.vlgmr.msra.gmra.mxu0 %v862_v44 }
 0x9c2   :  { %v1572_v45 = vpop.f32.mrf.mxu0 }
 0x9c4   :  { %v961_v46 = vpop.f32.mrf.mxu0 }
 0x9c5   :  { %976 = vmax.xlane.f32.xlu0 %v961_v46 }
 0x9c6   :  { %v1573_v47 = vpop.f32.mrf.mxu0 }
 0x9c8   :  { %v964_v48 = vpop.f32.mrf.mxu0 }
 0x9c9   :  { %980 = vmax.xlane.f32.xlu0 %v1572_v45  ;;  %978 = vmax.xlane.f32.xlu1 %v964_v48 }
 0x9cd   :  { %982 = vmax.xlane.f32.xlu0 %v1573_v47 }
 0xa4e   :  { %v977_v49 = vpop.xlane.xlu0 %976 }
 0xa4f   :  { %v984_v50 = vsub.f32 %v961_v46, %v977_v49 }
 0xa51   :  { %v988_v51 = vmul.f32 1.442695, %v984_v50 }
 0xa52   :  { %v981_v52 = vpop.xlane.xlu0 %980  ;;  %v979_v53 = vpop.xlane.xlu1 %978 }
 0xa53   :  { %1656 = vpow2.f32 %v988_v51  ;;  %v2078_v54 = vsub.f32 %v1572_v45, %v981_v52  ;;  %v985_v55 = vsub.f32 %v964_v48, %v979_v53 }
 0xa55   :  { %v992_v56 = vmul.f32 1.442695, %v2078_v54  ;;  %v990_v57 = vmul.f32 1.442695, %v985_v55 }
 0xa56   :  { %v983_v58 = vpop.xlane.xlu0 %982 }
 0xa57   :  { %1658 = vpow2.f32 %v992_v56  ;;  %v2081_v59 = vsub.f32 %v1573_v47, %v983_v58 }
 0xa58   :  { %1660 = vpow2.f32 %v990_v57 }
 0xa59   :  { %v994_v60 = vmul.f32 1.442695, %v2081_v59 }
 0xa5b   :  { %1662 = vpow2.f32 %v994_v60 }
 0xa60   :  { %v1657_v61 = vpop.eup %1656 }
 0xa61   :  { %996 = vadd.xlane.f32.xlu1 %v1657_v61 }
 0xa64   :  { %v1659_v62 = vpop.eup %1658 }
 0xa65   :  { %v1661_v63 = vpop.eup %1660  ;;  %1000 = vadd.xlane.f32.xlu1 %v1659_v62 }
 0xa66   :  { %998 = vadd.xlane.f32.xlu0 %v1661_v63 }
 0xa68   :  { %v1663_v0 = vpop.eup %1662 }
 0xa6a   :  { %1002 = vadd.xlane.f32.xlu0 %v1663_v0 }
 0xa6b   :  { %1763 = shalt.err (!%p1760_p10)
}
 0xa6c   :  { %1222 = dma.vmem_to_hbm [thread:$0]  %s1220_s30, 64, %s2168_s7, [#allocation14]   ;;  %v1025_v4 = vshrl.u32 %v87_v24, 7  ;;  %vm1056_vm8 = vcmask 1041409   ;;  %vm1058_vm9 = vcmask 1042434   ;;  %vm1060_vm10 = vcmask 1043459  }
 0xa6d   :  { %vm1062_vm11 = vcmask 1044484   ;;  %vm1064_vm12 = vcmask 1045509   ;;  %vm1066_vm13 = vcmask 1046534   ;;  %vm1068_vm14 = vcmask 1047559   ;;  %s1815_s7 = smov [#allocation12]  }
 0xa6e   :  { %v2088_v37 = vsub.s32 0, %v1025_v4  ;;  %v2090_v39 = vsub.s32 1, %v1025_v4  ;;  %v2092_v40 = vsub.s32 2, %v1025_v4  ;;  %v2094_v9 = vsub.s32 3, %v1025_v4  ;;  %s1206_s13 = sshll.u32 %s1815_s7, 4  ;;  %s1207_s13 = int_to_ptr.vmem [resolvable:$true] %s1206_s13 }
 0xa6f   :  { %s1772_s14 = scalar_lea.vmem %s1207_s13, 512  ;;  %p1777_p12 = scmp.lt.s32.totalorder %s1207_s13, %s1207_s13 }
 0xa70   :  { %p1773_p11 = scmp.ne.s32.totalorder %s1207_s13, %s1772_s14  ;;  %p1778_p13 = scmp.lt.s32.totalorder %s1772_s14, %s1772_s14 }
 0xa72   :  { %p1779_p0 = por %p1778_p13, %p1777_p12 }
 0xa74   :  { %p1780_p1 = pnand %p1779_p0, %p1773_p11 }
 0xaea   :  { %v997_v1 = vpop.xlane.xlu1 %996 }
 0xaeb   :  { %1664 = vlog2.f32 %v997_v1 }
 0xaee   :  { %v1001_v2 = vpop.xlane.xlu1 %1000 }
 0xaef   :  { %v999_v3 = vpop.xlane.xlu0 %998  ;;  %1666 = vlog2.f32 %v1001_v2 }
 0xaf0   :  { %1668 = vlog2.f32 %v999_v3 }
 0xaf3   :  { %v1003_v5 = vpop.xlane.xlu0 %1002 }
 0xaf4   :  { %1670 = vlog2.f32 %v1003_v5 }
 0xaf8   :  { %v1665_v6 = vpop.eup %1664 }
 0xaf9   :  { %v1005_v38 = vmul.f32 0.6931472, %v1665_v6 }
 0xafb   :  { %v1012_v7 = vsub.f32 %v984_v50, %v1005_v38 }
 0xafc   :  { %v1667_v8 = vpop.eup %1666 }
 0xafd   :  { %v1669_v10 = vpop.eup %1668  ;;  %v1020_v11 = vcombine.high %v1012_v7, %v1012_v7  ;;  %v1027_v24 = vrot.slane %v1012_v7, %v2088_v37  ;;  %v1075_v12 = vrot.slane %v1012_v7, %v2090_v39  ;;  %v1118_v14 = vrot.slane %v1012_v7, %v2092_v40 }
 0xafe   :  { %v1007_v15 = vmul.f32 0.6931472, %v1669_v10  ;;  %v1009_v16 = vmul.f32 0.6931472, %v1667_v8  ;;  %v1161_v26 = vrot.slane %v1012_v7, %v2094_v9 }
 0xaff   :  { %v1031_v13 = vrot.slane %v1020_v11, %v2088_v37  ;;  %v1079_v17 = vrot.slane %v1020_v11, %v2090_v39  ;;  %v1122_v18 = vrot.slane %v1020_v11, %v2092_v40  ;;  %v1165_v19 = vrot.slane %v1020_v11, %v2094_v9 }
 0xb00   :  { %v1013_v20 = vsub.f32 %v985_v55, %v1007_v15  ;;  %v1014_v21 = vsub.f32 %v2078_v54, %v1009_v16 }
 0xb01   :  { %v1057_v22 = vsel %vm1056_vm8, %v1031_v13, %v1027_v24  ;;  %v1104_v23 = vsel %vm1058_vm9, %v1079_v17, %v1075_v12  ;;  %v1147_v25 = vsel %vm1060_vm10, %v1122_v18, %v1118_v14  ;;  %v1190_v31 = vsel %vm1062_vm11, %v1165_v19, %v1161_v26  ;;  %v1671_v42 = vpop.eup %1670 }
 0xb02   :  { %v1021_v27 = vcombine.high %v1013_v20, %v1013_v20  ;;  %v1035_v28 = vrot.slane %v1013_v20, %v2088_v37  ;;  %v1083_v29 = vrot.slane %v1013_v20, %v2090_v39  ;;  %v1126_v30 = vrot.slane %v1013_v20, %v2092_v40 }
 0xb03   :  { %v1169_v32 = vrot.slane %v1013_v20, %v2094_v9  ;;  %v1022_v33 = vcombine.high %v1014_v21, %v1014_v21  ;;  %v1043_v46 = vrot.slane %v1014_v21, %v2088_v37  ;;  %v1091_v50 = vrot.slane %v1014_v21, %v2090_v39 }
 0xb04   :  { %v1039_v34 = vrot.slane %v1021_v27, %v2088_v37  ;;  %v1059_v35 = vsel %vm1058_vm9, %v1035_v28, %v1057_v22  ;;  %v1087_v36 = vrot.slane %v1021_v27, %v2090_v39  ;;  %v1105_v41 = vsel %vm1060_vm10, %v1083_v29, %v1104_v23 }
 0xb05   :  { %v1130_v43 = vrot.slane %v1021_v27, %v2092_v40  ;;  %v1148_v44 = vsel %vm1062_vm11, %v1126_v30, %v1147_v25  ;;  %v1173_v45 = vrot.slane %v1021_v27, %v2094_v9  ;;  %v1191_v47 = vsel %vm1064_vm12, %v1169_v32, %v1190_v31 }
 0xb06   :  { %v1061_v48 = vsel %vm1060_vm10, %v1039_v34, %v1059_v35  ;;  %v1106_v49 = vsel %vm1062_vm11, %v1087_v36, %v1105_v41  ;;  %v1047_v52 = vrot.slane %v1022_v33, %v2088_v37  ;;  %v1134_v53 = vrot.slane %v1014_v21, %v2092_v40 }
 0xb07   :  { %v1149_v51 = vsel %vm1064_vm12, %v1130_v43, %v1148_v44  ;;  %v1063_v54 = vsel %vm1062_vm11, %v1043_v46, %v1061_v48  ;;  %v1107_v55 = vsel %vm1064_vm12, %v1091_v50, %v1106_v49  ;;  %v1177_v56 = vrot.slane %v1014_v21, %v2094_v9 }
 0xb08   :  { %v1011_v57 = vmul.f32 0.6931472, %v1671_v42  ;;  %v1095_v58 = vrot.slane %v1022_v33, %v2090_v39  ;;  %v1150_v60 = vsel %vm1066_vm13, %v1134_v53, %v1149_v51  ;;  %v1138_v61 = vrot.slane %v1022_v33, %v2092_v40 }
 0xb09   :  { %v1192_v62 = vsel %vm1066_vm13, %v1173_v45, %v1191_v47  ;;  %v1065_v1 = vsel %vm1064_vm12, %v1047_v52, %v1063_v54  ;;  %v1181_v38 = vrot.slane %v1022_v33, %v2094_v9 }
 0xb0a   :  { %v1015_v63 = vsub.f32 %v2081_v59, %v1011_v57  ;;  %v1193_v0 = vsel %vm1068_vm14, %v1177_v56, %v1192_v62  ;;  %v1108_v2 = vsel %vm1066_vm13, %v1095_v58, %v1107_v55  ;;  %v1151_v3 = vsel %vm1068_vm14, %v1138_v61, %v1150_v60 }
 0xb0b   :  { %1199 = vst [vmem:[#allocation12 + $0x15] sm:$0xf8] %v1193_v0  ;;  %1156 = vst [vmem:[#allocation12 + $0xe] sm:$0xfc] %v1151_v3 }
 0xb0c   :  { %v1023_v4 = vcombine.high %v1015_v63, %v1015_v63  ;;  %v1051_v5 = vrot.slane %v1015_v63, %v2088_v37  ;;  %v1099_v6 = vrot.slane %v1015_v63, %v2090_v39  ;;  %v1185_v7 = vrot.slane %v1015_v63, %v2094_v9 }
 0xb0d   :  { %v1142_v24 = vrot.slane %v1015_v63, %v2092_v40 }
 0xb0e   :  { %v1067_v59 = vsel %vm1066_vm13, %v1051_v5, %v1065_v1  ;;  %v1055_v8 = vrot.slane %v1023_v4, %v2088_v37  ;;  %v1103_v10 = vrot.slane %v1023_v4, %v2090_v39  ;;  %v1109_v11 = vsel %vm1068_vm14, %v1099_v6, %v1108_v2 }
 0xb0f   :  { %v1194_v12 = vsel %vm1056_vm8, %v1185_v7, %v1181_v38  ;;  %1113 = vst [vmem:[#allocation12 + $0x7] sm:$0xfe] %v1109_v11  ;;  %v1146_v14 = vrot.slane %v1023_v4, %v2092_v40  ;;  %v1189_v15 = vrot.slane %v1023_v4, %v2094_v9 }
 0xb10   :  { %v1069_v16 = vsel %vm1068_vm14, %v1055_v8, %v1067_v59  ;;  %1114 = vst [vmem:[#allocation12 + $0xf] sm:$0x1] %v1103_v10 }
 0xb11   :  { %1071 = vst [vmem:[#allocation12] sm:$0xff] %v1069_v16  ;;  %v1152_v37 = vsel %vm1056_vm8, %v1146_v14, %v1142_v24  ;;  %v1195_v39 = vsel %vm1058_vm9, %v1189_v15, %v1194_v12 }
 0xb12   :  { %1157 = vst [vmem:[#allocation12 + $0x16] sm:$0x3] %v1152_v37  ;;  %1200 = vst [vmem:[#allocation12 + $0x1d] sm:$0x7] %v1195_v39 }
 0xb13   :  { %1783 = shalt.err (!%p1780_p1)
}
 0xb14   :  { %1212 = dma.vmem_to_hbm [thread:$0]  %s1207_s13, 512, %s2167_s6, [#allocation6], %s1806_s11, %s1806_s11, %s1807_s12  }
 0xb15   :  { %1798 = dma.done.wait [#allocation6], 512  }
 0xb16   :  { %1799 = vsyncadd [#allocation6], 4294966784 }
 0xb17   :  { %1800 = dma.done.wait [#allocation14], 64  }
 0xb18   :  { %1801 = vsyncadd [#allocation14], 4294967232 }
 0xb19   :  { %1229 = vsyncpa [#allocation5], 1 }
 0xb1a   :  { %1230 = vsyncpa [#allocation8], 1 }
 0xb1b   :  { %1231 = vsyncpa [#allocation11], 1 }
 0xb1c   :  { %1232 = vsyncpa [#allocation6], 1 }
 0xb1d   :  { %1233 = vsyncpa [#allocation14], 1 }

</bundles_post_ra>
